<compile_context>
chip_gen: v6e
topology: v6e:2x2x1
jax: 0.10.0
libtpu: 0.0.40
codegen_flags: <defaults>
</compile_context>

<pallas_src>
import jax
import jax.numpy as jnp
from jax.experimental import pallas as pl
from jax.experimental.pallas import tpu as pltpu

VOCAB = 127          # vocab_size
EMB = 32             # embedding_dim
CTX = 8              # context window length
BATCH = 8
V1 = VOCAB + 1       # vocab_size + 1 (padding row 0), == 128 -> lane aligned


def cbow_kernel(idx_ref, emb_t_ref, w_t_ref, b_ref, out_ref):
    # idx_ref:   (B, C)   int32 context indices
    # emb_t_ref: (E, V1)  f32 embedding table, transposed (lane-dense)
    # w_t_ref:   (E, V1)  f32 linear weight, stored transposed (x @ W^T form)
    # b_ref:     (1, V1)  f32 linear bias
    # out_ref:   (B, V1)  f32 log-probabilities
    B, v1 = out_ref.shape
    C = idx_ref.shape[1]

    # --- Embedding(max_norm=1) renorm, computed in the lane-dense (E, V1) layout.
    # sq[v] = ||emb[v]||^2 via a sublane reduction over the E=32 rows.
    emb_t = emb_t_ref[...]                                        # (E, V1)
    sq = jnp.sum(emb_t * emb_t, axis=0, keepdims=True)            # (1, V1)
    # torch renorms with max_norm/(norm + 1e-7); EUP rsqrt is within ~1e-7 of
    # that.  Padding row 0 has sq == 0 -> scale 1.0.
    scale = jnp.where(sq > 1.0, jax.lax.rsqrt(sq), 1.0)           # (1, V1)

    # --- Bag-of-words counts on the VPU (no onehot / pool matmuls). ---
    idx = idx_ref[...]                                            # (B, C) int32
    lane = jax.lax.broadcasted_iota(jnp.int32, (B, v1), 1)        # (B, V1): 1 vreg
    counts = jnp.zeros((B, v1), jnp.float32)
    for c in range(C):                                            # unrolled, C = 8
        counts = counts + (idx[:, c:c + 1] == lane).astype(jnp.float32)

    # Fold the renorm scale and the 1/C of the context mean into the counts,
    # keeping everything (B, V1) lane-dense.
    counts_scaled = counts * (scale * (1.0 / C))                  # (B, V1)

    # --- Logits: one input-independent (V1,V1) product + one lane-dense matmul.
    # fused[v, u] = sum_e emb[v, e] * W^T[e, u]   (contract the E sublane dim;
    # this is the trans_a / TN MXU form of pl.dot).  In a weight-reuse setting
    # this product would be precomputed outside the kernel.
    fused = jax.lax.dot_general(
        emb_t, w_t_ref[...],
        dimension_numbers=(((0,), (0,)), ((), ())),
        preferred_element_type=jnp.float32)                       # (V1, V1)
    logits = jnp.dot(counts_scaled, fused,
                     preferred_element_type=jnp.float32) + b_ref[...]  # (B, V1)

    # --- LogSoftmax(dim=-1), numerically stable (exp/log on the EUP). ---
    m = jnp.max(logits, axis=-1, keepdims=True)
    shifted = logits - m
    lse = jnp.log(jnp.sum(jnp.exp(shifted), axis=-1, keepdims=True))
    out_ref[...] = shifted - lse


def cbow_forward(indices, emb_t, lin_w_t, lin_b):
    """indices: (B, C) int32; emb_t: (E, V1) transposed table; lin_w_t: (E, V1); lin_b: (V1,)."""
    B, C = indices.shape
    E, v1 = emb_t.shape

    flops = 2 * v1 * E * v1 + 2 * B * v1 * v1
    transcendentals = v1 + B * v1 + B                 # rsqrt + exp + log
    bytes_accessed = (indices.size * 4 + emb_t.size * 4 + lin_w_t.size * 4 +
                      v1 * 4 + B * v1 * 4)

    return pl.pallas_call(
        cbow_kernel,
        out_shape=jax.ShapeDtypeStruct((B, v1), jnp.float32),
        in_specs=[
            pl.BlockSpec(memory_space=pltpu.MemorySpace.VMEM),   # indices (B, C)
            pl.BlockSpec(memory_space=pltpu.MemorySpace.VMEM),   # embedding table^T
            pl.BlockSpec(memory_space=pltpu.MemorySpace.VMEM),   # linear weight^T
            pl.BlockSpec(memory_space=pltpu.MemorySpace.VMEM),   # bias
        ],
        out_specs=pl.BlockSpec(memory_space=pltpu.MemorySpace.VMEM),
        cost_estimate=pl.CostEstimate(flops=flops,
                                      transcendentals=transcendentals,
                                      bytes_accessed=bytes_accessed),
    )(indices.astype(jnp.int32), emb_t, lin_w_t, lin_b.reshape(1, v1))


def cbow_reference(indices, emb_weight, lin_w_t, lin_b):
    """Pure-JAX reference (same renorm formula) for a sanity check."""
    sq = jnp.sum(emb_weight * emb_weight, axis=-1, keepdims=True)
    scale = jnp.where(sq > 1.0, jax.lax.rsqrt(sq), 1.0)
    emb_r = emb_weight * scale
    gathered = jnp.take(emb_r, indices, axis=0)                    # (B, C, E)
    mean = jnp.mean(gathered, axis=1)                              # (B, E)
    logits = mean @ lin_w_t + lin_b[None, :]
    return jax.nn.log_softmax(logits, axis=-1)


if __name__ == "__main__":
    key = jax.random.PRNGKey(0)
    k_emb, k_w, k_b, k_idx = jax.random.split(key, 4)

    # Deterministic parameter init (synthetic, not a checkpoint load).
    emb_weight = jax.random.normal(k_emb, (V1, EMB), jnp.float32)
    emb_weight = emb_weight.at[0].set(0.0)          # padding_idx=0 -> zero row
    lin_w_t = jax.random.normal(k_w, (EMB, V1), jnp.float32) * 0.1
    lin_b = jax.random.normal(k_b, (V1,), jnp.float32) * 0.1

    indices = jax.random.randint(k_idx, (BATCH, CTX), 0, V1, dtype=jnp.int32)

    # Kernel takes the embedding table transposed (E, V1) -> lane-dense VMEM tile.
    out = cbow_forward(indices, emb_weight.T, lin_w_t, lin_b)
    jax.block_until_ready(out)
    assert out.shape == (BATCH, V1)

    ref = cbow_reference(indices, emb_weight, lin_w_t, lin_b)
    # Fused (emb @ W^T) reassociation + MXU rounding: typically agrees to ~1e-5,
    # assert with comfortable margin.
    assert jnp.allclose(out, ref, atol=1e-2, rtol=1e-2), float(jnp.max(jnp.abs(out - ref)))

    # TODO(synk): PyTorch max_norm also writes the renormalized rows back into
    # the embedding weight (in-place side effect); not reproduced here.
    print("KERNEL_OK")
</pallas_src>

<mosaic_0001>
module attributes {stable_mosaic.version = 11 : i64} {
  func.func @cbow_kernel(%arg0: memref<8x8xi32, #tpu.memory_space<vmem>>, %arg1: memref<32x128xf32, #tpu.memory_space<vmem>>, %arg2: memref<32x128xf32, #tpu.memory_space<vmem>>, %arg3: memref<1x128xf32, #tpu.memory_space<vmem>>, %arg4: memref<8x128xf32, #tpu.memory_space<vmem>>) attributes {dimension_semantics = [], scalar_prefetch = 0 : i64, scratch_operands = 0 : i64, tpu.core_type = #tpu.core_type<tc>} {
    %c0 = arith.constant 0 : index
    %c0_0 = arith.constant 0 : index
    %0 = vector.load %arg1[%c0, %c0_0] : memref<32x128xf32, #tpu.memory_space<vmem>>, vector<32x128xf32>
    %1 = arith.mulf %0, %0 : vector<32x128xf32>
    %cst = arith.constant dense<0.000000e+00> : vector<128xf32>
    %2 = vector.multi_reduction <add>, %1, %cst [0] : vector<32x128xf32> to vector<128xf32>
    %3 = vector.shape_cast %2 : vector<128xf32> to vector<1x128xf32>
    %cst_1 = arith.constant 1.000000e+00 : f32
    %4 = vector.broadcast %cst_1 : f32 to vector<1x128xf32>
    %5 = arith.cmpf ogt, %3, %4 : vector<1x128xf32>
    %6 = math.rsqrt %3 : vector<1x128xf32>
    %cst_2 = arith.constant 1.000000e+00 : f32
    %7 = vector.broadcast %cst_2 : f32 to vector<1x128xf32>
    %8 = arith.select %5, %6, %7 : vector<1x128xi1>, vector<1x128xf32>
    %c0_3 = arith.constant 0 : index
    %c0_4 = arith.constant 0 : index
    %9 = vector.load %arg0[%c0_3, %c0_4] : memref<8x8xi32, #tpu.memory_space<vmem>>, vector<8x8xi32>
    %10 = tpu.iota {dimensions = array<i32: 1>} : vector<8x128xi32>
    %cst_5 = arith.constant 0.000000e+00 : f32
    %11 = vector.broadcast %cst_5 : f32 to vector<8x128xf32>
    %12 = vector.extract_strided_slice %9 {offsets = [0, 0], sizes = [8, 1], strides = [1, 1]} : vector<8x8xi32> to vector<8x1xi32>
    %13 = vector.broadcast %12 : vector<8x1xi32> to vector<8x128xi32>
    %14 = arith.cmpi eq, %13, %10 : vector<8x128xi32>
    %15 = arith.extui %14 : vector<8x128xi1> to vector<8x128xi32>
    %16 = arith.sitofp %15 : vector<8x128xi32> to vector<8x128xf32>
    %17 = arith.addf %11, %16 : vector<8x128xf32>
    %18 = vector.extract_strided_slice %9 {offsets = [0, 1], sizes = [8, 1], strides = [1, 1]} : vector<8x8xi32> to vector<8x1xi32>
    %19 = vector.broadcast %18 : vector<8x1xi32> to vector<8x128xi32>
    %20 = arith.cmpi eq, %19, %10 : vector<8x128xi32>
    %21 = arith.extui %20 : vector<8x128xi1> to vector<8x128xi32>
    %22 = arith.sitofp %21 : vector<8x128xi32> to vector<8x128xf32>
    %23 = arith.addf %17, %22 : vector<8x128xf32>
    %24 = vector.extract_strided_slice %9 {offsets = [0, 2], sizes = [8, 1], strides = [1, 1]} : vector<8x8xi32> to vector<8x1xi32>
    %25 = vector.broadcast %24 : vector<8x1xi32> to vector<8x128xi32>
    %26 = arith.cmpi eq, %25, %10 : vector<8x128xi32>
    %27 = arith.extui %26 : vector<8x128xi1> to vector<8x128xi32>
    %28 = arith.sitofp %27 : vector<8x128xi32> to vector<8x128xf32>
    %29 = arith.addf %23, %28 : vector<8x128xf32>
    %30 = vector.extract_strided_slice %9 {offsets = [0, 3], sizes = [8, 1], strides = [1, 1]} : vector<8x8xi32> to vector<8x1xi32>
    %31 = vector.broadcast %30 : vector<8x1xi32> to vector<8x128xi32>
    %32 = arith.cmpi eq, %31, %10 : vector<8x128xi32>
    %33 = arith.extui %32 : vector<8x128xi1> to vector<8x128xi32>
    %34 = arith.sitofp %33 : vector<8x128xi32> to vector<8x128xf32>
    %35 = arith.addf %29, %34 : vector<8x128xf32>
    %36 = vector.extract_strided_slice %9 {offsets = [0, 4], sizes = [8, 1], strides = [1, 1]} : vector<8x8xi32> to vector<8x1xi32>
    %37 = vector.broadcast %36 : vector<8x1xi32> to vector<8x128xi32>
    %38 = arith.cmpi eq, %37, %10 : vector<8x128xi32>
    %39 = arith.extui %38 : vector<8x128xi1> to vector<8x128xi32>
    %40 = arith.sitofp %39 : vector<8x128xi32> to vector<8x128xf32>
    %41 = arith.addf %35, %40 : vector<8x128xf32>
    %42 = vector.extract_strided_slice %9 {offsets = [0, 5], sizes = [8, 1], strides = [1, 1]} : vector<8x8xi32> to vector<8x1xi32>
    %43 = vector.broadcast %42 : vector<8x1xi32> to vector<8x128xi32>
    %44 = arith.cmpi eq, %43, %10 : vector<8x128xi32>
    %45 = arith.extui %44 : vector<8x128xi1> to vector<8x128xi32>
    %46 = arith.sitofp %45 : vector<8x128xi32> to vector<8x128xf32>
    %47 = arith.addf %41, %46 : vector<8x128xf32>
    %48 = vector.extract_strided_slice %9 {offsets = [0, 6], sizes = [8, 1], strides = [1, 1]} : vector<8x8xi32> to vector<8x1xi32>
    %49 = vector.broadcast %48 : vector<8x1xi32> to vector<8x128xi32>
    %50 = arith.cmpi eq, %49, %10 : vector<8x128xi32>
    %51 = arith.extui %50 : vector<8x128xi1> to vector<8x128xi32>
    %52 = arith.sitofp %51 : vector<8x128xi32> to vector<8x128xf32>
    %53 = arith.addf %47, %52 : vector<8x128xf32>
    %54 = vector.extract_strided_slice %9 {offsets = [0, 7], sizes = [8, 1], strides = [1, 1]} : vector<8x8xi32> to vector<8x1xi32>
    %55 = vector.broadcast %54 : vector<8x1xi32> to vector<8x128xi32>
    %56 = arith.cmpi eq, %55, %10 : vector<8x128xi32>
    %57 = arith.extui %56 : vector<8x128xi1> to vector<8x128xi32>
    %58 = arith.sitofp %57 : vector<8x128xi32> to vector<8x128xf32>
    %59 = arith.addf %53, %58 : vector<8x128xf32>
    %cst_6 = arith.constant 1.250000e-01 : f32
    %60 = vector.broadcast %cst_6 : f32 to vector<1x128xf32>
    %61 = arith.mulf %8, %60 : vector<1x128xf32>
    %62 = vector.broadcast %61 : vector<1x128xf32> to vector<8x128xf32>
    %63 = arith.mulf %59, %62 : vector<8x128xf32>
    %c0_7 = arith.constant 0 : index
    %c0_8 = arith.constant 0 : index
    %64 = vector.load %arg2[%c0_7, %c0_8] : memref<32x128xf32, #tpu.memory_space<vmem>>, vector<32x128xf32>
    %cst_9 = arith.constant dense<0.000000e+00> : vector<128x128xf32>
    %65 = tpu.matmul %0, %64, %cst_9 {dimension_numbers = #tpu.dot_dimension_numbers<[0], [0], [1], [1], [0, 1, 1, 1], [], []>} : vector<32x128xf32>, vector<32x128xf32>, vector<128x128xf32> -> vector<128x128xf32>
    %cst_10 = arith.constant dense<0.000000e+00> : vector<8x128xf32>
    %66 = tpu.matmul %63, %65, %cst_10 {dimension_numbers = #tpu.dot_dimension_numbers<[1], [0], [0], [1], [0, 0, 1, 1], [], []>} : vector<8x128xf32>, vector<128x128xf32>, vector<8x128xf32> -> vector<8x128xf32>
    %c0_11 = arith.constant 0 : index
    %c0_12 = arith.constant 0 : index
    %67 = vector.load %arg3[%c0_11, %c0_12] : memref<1x128xf32, #tpu.memory_space<vmem>>, vector<1x128xf32>
    %68 = vector.broadcast %67 : vector<1x128xf32> to vector<8x128xf32>
    %69 = arith.addf %66, %68 : vector<8x128xf32>
    %cst_13 = arith.constant dense<0xFF800000> : vector<8xf32>
    %70 = vector.multi_reduction <maximumf>, %69, %cst_13 [1] : vector<8x128xf32> to vector<8xf32>
    %71 = vector.shape_cast %70 : vector<8xf32> to vector<8x1xf32>
    %72 = vector.broadcast %71 : vector<8x1xf32> to vector<8x128xf32>
    %73 = arith.subf %69, %72 : vector<8x128xf32>
    %74 = math.exp %73 : vector<8x128xf32>
    %cst_14 = arith.constant dense<0.000000e+00> : vector<8xf32>
    %75 = vector.multi_reduction <add>, %74, %cst_14 [1] : vector<8x128xf32> to vector<8xf32>
    %76 = vector.shape_cast %75 : vector<8xf32> to vector<8x1xf32>
    %77 = math.log %76 : vector<8x1xf32>
    %78 = vector.broadcast %77 : vector<8x1xf32> to vector<8x128xf32>
    %79 = arith.subf %73, %78 : vector<8x128xf32>
    %c0_15 = arith.constant 0 : index
    %c0_16 = arith.constant 0 : index
    %80 = vector.load %arg4[%c0_15, %c0_16] : memref<8x128xf32, #tpu.memory_space<vmem>>, vector<8x128xf32>
    tpu.vector_store %arg4[%c0_15, %c0_16], %79 {strides = array<i32>} : memref<8x128xf32, #tpu.memory_space<vmem>>, vector<8x128xf32>,
    return
  }
}

</mosaic_0001>

<bundles_post_ra>
// kernel: tpu_custom_call.1
= control target key start
LH: loop header
LB: loop body
LE: loop exit
PB: predicated region body
PF: predicated region fallthrough
CT: control target
= control target key end

     0   :  { %9 = vsyncpa [#allocation3], 0  ;;  %s840_s0 = inlined_call_operand.hbm [shape: s32[8,8], index: 0, kind: input, shape index: {}]   ;;  %s841_s1 = inlined_call_operand.hbm [shape: f32[32,128], index: 1, kind: input, shape index: {}]   ;;  %s842_s2 = inlined_call_operand.hbm [shape: f32[32,128], index: 2, kind: input, shape index: {}]   ;;  %s843_s3 = inlined_call_operand.vmem [shape: f32[1,128], index: 3, kind: input, shape index: {}]   ;;  %s844_s4 = inlined_call_operand.hbm [shape: f32[8,128], index: 4, kind: output, shape index: {}]  }
   0x1   :  { %10 = vsyncpa [#allocation6], 0 }
   0x2   :  { %11 = vsyncpa [#allocation4], 0  ;;  %s718_s15 = smov [#allocation5]  }
   0x3   :  { %s27_s16 = sshll.u32 %s718_s15, 4  ;;  %s28_s16 = int_to_ptr.vmem [resolvable:$true] %s27_s16 }
   0x4   :  { %s640_s17 = scalar_lea.vmem %s28_s16, 512  ;;  %p645_p1 = scmp.lt.s32.totalorder %s28_s16, %s28_s16 }
   0x5   :  { %p641_p0 = scmp.ne.s32.totalorder %s28_s16, %s640_s17  ;;  %p646_p2 = scmp.lt.s32.totalorder %s640_s17, %s640_s17 }
   0x7   :  { %p647_p3 = por %p646_p2, %p645_p1 }
   0x9   :  { %p648_p4 = pnand %p647_p3, %p641_p0 }
   0xb   :  { %651 = shalt.err (!%p648_p4)
}
   0xc   :  { %s719_s18 = smov 128   ;;  %s720_s19 = smov 8  }
   0xd   :  { %33 = dma.hbm_to_vmem [thread:$0]  %s841_s1, 512, %s28_s16, [#allocation6], %s719_s18, %s719_s18, %s720_s19  }
   0xe   :  { %s721_s22 = smov [#allocation2]   ;;  %s722_s24 = smov [#allocation7]  }
   0xf   :  { %s18_s23 = sshll.u32 %s721_s22, 4  ;;  %s39_s25 = sshll.u32 %s722_s24, 4  ;;  %s19_s23 = int_to_ptr.vmem [resolvable:$true] %s18_s23  ;;  %s40_s25 = int_to_ptr.vmem [resolvable:$true] %s39_s25 }
  0x10   :  { %s660_s26 = scalar_lea.vmem %s19_s23, 128  ;;  %p665_p6 = scmp.lt.s32.totalorder %s19_s23, %s19_s23 }
  0x11   :  { %p661_p5 = scmp.ne.s32.totalorder %s19_s23, %s660_s26  ;;  %p666_p7 = scmp.lt.s32.totalorder %s660_s26, %s660_s26 }
  0x13   :  { %p667_p8 = por %p666_p7, %p665_p6 }
  0x15   :  { %p668_p9 = pnand %p667_p8, %p661_p5 }
  0x17   :  { %671 = shalt.err (!%p668_p9)
}
  0x18   :  { %21 = dma.hbm_to_vmem [thread:$0]  %s840_s0, 128, %s19_s23, [#allocation3]  }
  0x19   :  { %s680_s29 = scalar_lea.vmem %s40_s25, 512  ;;  %p685_p11 = scmp.lt.s32.totalorder %s40_s25, %s40_s25 }
  0x1a   :  { %p681_p10 = scmp.ne.s32.totalorder %s40_s25, %s680_s29  ;;  %p686_p12 = scmp.lt.s32.totalorder %s680_s29, %s680_s29 }
  0x1c   :  { %p687_p13 = por %p686_p12, %p685_p11 }
  0x1e   :  { %p688_p0 = pnand %p687_p13, %p681_p10 }
  0x20   :  { %691 = shalt.err (!%p688_p0)
}
  0x21   :  { %45 = dma.hbm_to_vmem [thread:$0]  %s842_s2, 512, %s40_s25, [#allocation6], %s719_s18, %s719_s18, %s720_s19  }
  0x22   :  { %712 = dma.done.wait [#allocation3], 128  }
  0x23   :  { %713 = vsyncadd [#allocation3], 4294967168 }
  0x24   :  { %714 = dma.done.wait [#allocation6], 1024  }
  0x25   :  { %715 = vsyncadd [#allocation6], 4294966272  ;;  %v57_v0 = vld [vmem:[#allocation5] sm:$0xff]  ;;  %v58_v1 = vld [vmem:[#allocation5 + $0x8] sm:$0xff]  ;;  %v723_v16 = vmov 0   ;;  %v724_v17 = vmov 4   ;;  %v78_v55 = vlaneseq }
  0x26   :  { %v59_v2 = vld [vmem:[#allocation5 + $0x10] sm:$0xff]  ;;  %142 = vxpose.xlu0.b32.start [1/4] (short) %v57_v0, 128  ;;  %v61_v3 = vmul.f32 %v57_v0, %v57_v0  ;;  %v62_v4 = vmul.f32 %v58_v1, %v58_v1  ;;  %v141_v6 = vld [vmem:[#allocation7 + $0x18] sm:$0xff]  ;;  %v139_v11 = vld [vmem:[#allocation7 + $0x8] sm:$0xff]  ;;  %617 = vset.pattern.permute.xlu1 %v723_v16  ;;  %v725_v18 = vmov 1   ;;  %v726_v19 = vmov 2   ;;  %s733_s5 = smov [#allocation8]  }
  0x27   :  { %v63_v5 = vmul.f32 %v59_v2, %v59_v2  ;;  %v140_v7 = vld [vmem:[#allocation7 + $0x10] sm:$0xff]  ;;  %v60_v8 = vld [vmem:[#allocation5 + $0x18] sm:$0xff]  ;;  %534 = vmatprep.subr.mxu0 %v141_v6  ;;  %v138_v13 = vld [vmem:[#allocation7] sm:$0xff]  ;;  %v727_v20 = vmov 3   ;;  %v728_v21 = vmov 5   ;;  %v729_v22 = vmov 6  }
  0x28   :  { %v65_v9 = vadd.f32 %v62_v4, %v61_v3  ;;  %v64_v10 = vmul.f32 %v60_v8, %v60_v8  ;;  %535 = vmatpush3.msra.mxu0 %v141_v6  ;;  %v77_v15 = vld [vmem:[#allocation2] sm:$0xff]  ;;  %v730_v23 = vmov 7   ;;  %vm174_vm0 = vcmask 261120   ;;  %s462_s6 = sshll.u32 %s733_s5, 4  ;;  %s463_s6 = int_to_ptr.vmem [resolvable:$true] %s462_s6 }
  0x29   :  { %536 = vmatprep.subr.mxu0 %v140_v7  ;;  %81 = vperm.xlu1 %617, %v77_v15   ;;  %v731_v40 = vmov 0.0   ;;  %vm732_vm1 = vmmov 0   ;;  %v79_v58 = vand.u32 127, %v78_v55  ;;  %p697_p2 = scmp.lt.s32.totalorder %s463_s6, %s463_s6 }
  0x2a   :  { %143 = vxpose.xlu0.b32.cont [2/4] (short) %v58_v1, 128  ;;  %v66_v12 = vadd.f32 %v65_v9, %v63_v5  ;;  %537 = vmatpush3.msra.mxu0 %v140_v7 }
  0x2b   :  { %538 = vmatprep.subr.mxu0 %v139_v11  ;;  %566 = vmatprep.subr.mxu1 %v731_v40 }
  0x2c   :  { %v768_v14 = vadd.f32 %v66_v12, %v64_v10  ;;  %539 = vmatpush3.msra.mxu0 %v139_v11  ;;  %598 = vmatprep.mubr.msk.f32.mxu1 %vm732_vm1, %v731_v40 }
  0x2d   :  { %540 = vmatprep.subr.mxu0 %v138_v13  ;;  %618 = vset.pattern.permute.xlu1 %v725_v18 }
  0x2e   :  { %144 = vxpose.xlu0.b32.cont [3/4] (short) %v59_v2, 128  ;;  %541 = vmatpush3.msra.mxu0 %v138_v13  ;;  %v68_v51 = vrot.slane %v768_v14, 4 }
  0x2f   :  { %88 = vperm.xlu1 %618, %v77_v15  }
  0x30   :  { %v69_v53 = vadd.f32 %v68_v51, %v768_v14 }
  0x32   :  { %145 = vxpose.xlu0.b32.end [4/4] (short) %v60_v8, 128  ;;  %v70_v57 = vrot.slane %v69_v53, 2 }
  0x33   :  { %619 = vset.pattern.permute.xlu1 %v726_v19 }
  0x34   :  { %95 = vperm.xlu1 %619, %v77_v15   ;;  %v71_v62 = vadd.f32 %v70_v57, %v69_v53 }
  0x36   :  { %v72_v0 = vrot.slane %v71_v62, 1 }
  0x38   :  { %620 = vset.pattern.permute.xlu1 %v727_v20  ;;  %v73_v8 = vadd.f32 %v72_v0, %v71_v62 }
  0x39   :  { %102 = vperm.xlu1 %620, %v77_v15  }
  0x3a   :  { %626 = vrsqrt.f32 %v73_v8  ;;  %vm74_vm10 = vcmp.gt.f32.partialorder %v73_v8, 1.0 }
  0x3d   :  { %622 = vset.pattern.permute.xlu1 %v728_v21 }
  0x3e   :  { %116 = vperm.xlu1 %622, %v77_v15  }
  0x42   :  { %623 = vset.pattern.permute.xlu1 %v729_v22 }
  0x43   :  { %123 = vperm.xlu1 %623, %v77_v15  }
  0x47   :  { %624 = vset.pattern.permute.xlu1 %v730_v23  ;;  %v627_v21 = vpop.eup %626 }
  0x48   :  { %130 = vperm.xlu1 %624, %v77_v15  }
  0x5b   :  { %621 = vset.pattern.permute.xlu0 %v724_v17 }
  0x8b   :  { %109 = vperm.xlu0 %621, %v77_v15  }
  0x8f   :  { %625 = vset.pattern.permute.xlu0 %v730_v23 }
  0xa2   :  { %v158_v24 = vpop.trf.xlu0 }
  0xa3   :  { %542 = vmatprep.mubr.msk.f32.mxu0 %vm174_vm0, %v158_v24  ;;  %v76_v24 = vsel %vm74_vm10, %v627_v21, 1.0 }
  0xa4   :  { %v82_v49 = vpop.permute.xlu1 %81 }
  0xa5   :  { %vm83_vm2 = vcmp.eq.s32.totalorder %v82_v49, %v79_v58 }
  0xa6   :  { %v159_v25 = vpop.trf.xlu0  ;;  %v472_v1 = vsel %vm83_vm2, 1.0, %v731_v40 }
  0xa7   :  { %543 = vmatmul.mubr.msk.f32.vlgmr.msra.gmra.mxu0 %vm174_vm0, %v159_v25 }
  0xaa   :  { %v160_v26 = vpop.trf.xlu0  ;;  %v89_v54 = vpop.permute.xlu1 %88 }
  0xab   :  { %545 = vmatprep.mubr.msk.f32.mxu0 %vm174_vm0, %v160_v26  ;;  %vm90_vm3 = vcmp.eq.s32.totalorder %v89_v54, %v79_v58  ;;  %v136_v26 = vmul.f32 0.125, %v76_v24 }
  0xac   :  { %v473_v2 = vsel %vm90_vm3, 1.0, %v731_v40 }
  0xad   :  { %v93_v5 = vadd.f32 %v473_v2, %v472_v1 }
  0xae   :  { %v161_v27 = vpop.trf.xlu0 }
  0xaf   :  { %546 = vmatmul.mubr.msk.f32.gmra.mxu0 %vm174_vm0, %v161_v27  ;;  %v96_v60 = vpop.permute.xlu1 %95 }
  0xb0   :  { %vm97_vm4 = vcmp.eq.s32.totalorder %v96_v60, %v79_v58 }
  0xb1   :  { %v474_v7 = vsel %vm97_vm4, 1.0, %v731_v40 }
  0xb2   :  { %v162_v28 = vpop.trf.xlu0  ;;  %v100_v11 = vadd.f32 %v474_v7, %v93_v5 }
  0xb3   :  { %548 = vmatprep.mubr.msk.f32.mxu0 %vm174_vm0, %v162_v28  ;;  %v496_v28 = vld [vmem:[%s843_s3] ss:$0 sm:$0xff]  ;;  %s692_s3 = scalar_lea.vmem %s463_s6, 128 }
  0xb4   :  { %v103_v3 = vpop.permute.xlu1 %102  ;;  %p693_p1 = scmp.ne.s32.totalorder %s463_s6, %s692_s3  ;;  %p698_p3 = scmp.lt.s32.totalorder %s692_s3, %s692_s3 }
  0xb5   :  { %vm104_vm5 = vcmp.eq.s32.totalorder %v103_v3, %v79_v58 }
  0xb6   :  { %v163_v29 = vpop.trf.xlu0  ;;  %v475_v12 = vsel %vm104_vm5, 1.0, %v731_v40  ;;  %p699_p4 = por %p698_p3, %p697_p2 }
  0xb7   :  { %549 = vmatmul.mubr.msk.f32.gmra.mxu0 %vm174_vm0, %v163_v29  ;;  %v107_v13 = vadd.f32 %v475_v12, %v100_v11 }
  0xb8   :  { %p700_p5 = pnand %p699_p4, %p693_p1 }
  0xb9   :  { %v117_v9 = vpop.permute.xlu1 %116 }
  0xba   :  { %v164_v30 = vpop.trf.xlu0  ;;  %vm118_vm7 = vcmp.eq.s32.totalorder %v117_v9, %v79_v58 }
  0xbb   :  { %551 = vmatprep.mubr.msk.f32.mxu0 %vm174_vm0, %v164_v30  ;;  %v477_v17 = vsel %vm118_vm7, 1.0, %v731_v40 }
  0xbe   :  { %v165_v31 = vpop.trf.xlu0  ;;  %v124_v15 = vpop.permute.xlu1 %123 }
  0xbf   :  { %552 = vmatmul.mubr.msk.f32.gmra.mxu0 %vm174_vm0, %v165_v31  ;;  %vm125_vm8 = vcmp.eq.s32.totalorder %v124_v15, %v79_v58 }
  0xc0   :  { %v478_v20 = vsel %vm125_vm8, 1.0, %v731_v40 }
  0xc2   :  { %v166_v32 = vpop.trf.xlu0 }
  0xc3   :  { %554 = vmatprep.mubr.msk.f32.mxu0 %vm174_vm0, %v166_v32  ;;  %v131_v18 = vpop.permute.xlu1 %130 }
  0xc4   :  { %vm132_vm9 = vcmp.eq.s32.totalorder %v131_v18, %v79_v58 }
  0xc5   :  { %v479_v23 = vsel %vm132_vm9, 1.0, %v731_v40 }
  0xc6   :  { %v167_v33 = vpop.trf.xlu0 }
  0xc7   :  { %555 = vmatmul.mubr.msk.f32.gmra.mxu0 %vm174_vm0, %v167_v33 }
  0xca   :  { %v168_v34 = vpop.trf.xlu0 }
  0xcb   :  { %557 = vmatprep.mubr.msk.f32.mxu0 %vm174_vm0, %v168_v34 }
  0xce   :  { %v169_v35 = vpop.trf.xlu0 }
  0xcf   :  { %558 = vmatmul.mubr.msk.f32.gmra.mxu0 %vm174_vm0, %v169_v35 }
  0xd2   :  { %v170_v36 = vpop.trf.xlu0 }
  0xd3   :  { %560 = vmatprep.mubr.msk.f32.mxu0 %vm174_vm0, %v170_v36 }
  0xd6   :  { %v171_v37 = vpop.trf.xlu0 }
  0xd7   :  { %561 = vmatmul.mubr.msk.f32.gmra.mxu0 %vm174_vm0, %v171_v37 }
  0xda   :  { %v172_v38 = vpop.trf.xlu0 }
  0xdb   :  { %563 = vmatprep.mubr.msk.f32.mxu0 %vm174_vm0, %v172_v38 }
  0xde   :  { %v173_v39 = vpop.trf.xlu0 }
  0xdf   :  { %564 = vmatmul.mubr.msk.f32.gmra.mxu0 %vm174_vm0, %v173_v39 }
 0x106   :  { %v110_v10 = vpop.permute.xlu0 %109 }
 0x107   :  { %vm111_vm6 = vcmp.eq.s32.totalorder %v110_v10, %v79_v58 }
 0x108   :  { %v476_v14 = vsel %vm111_vm6, 1.0, %v731_v40 }
 0x109   :  { %v114_v16 = vadd.f32 %v476_v14, %v107_v13 }
 0x10b   :  { %v121_v19 = vadd.f32 %v477_v17, %v114_v16 }
 0x10d   :  { %v128_v22 = vadd.f32 %v478_v20, %v121_v19 }
 0x10f   :  { %v135_v25 = vadd.f32 %v479_v23, %v128_v22 }
 0x111   :  { %v137_v27 = vmul.f32 %v136_v26, %v135_v25 }
 0x167   :  { %v788_v41 = vpop.f32.mrf.mxu0 }
 0x169   :  { %v790_v42 = vpop.f32.mrf.mxu0 }
 0x16f   :  { %v792_v43 = vpop.f32.mrf.mxu0 }
 0x171   :  { %v794_v44 = vpop.f32.mrf.mxu0 }
 0x177   :  { %v796_v45 = vpop.f32.mrf.mxu0 }
 0x179   :  { %v798_v46 = vpop.f32.mrf.mxu0 }
 0x17f   :  { %v553_v47 = vpop.f32.mrf.mxu0 }
 0x181   :  { %v800_v48 = vpop.f32.mrf.mxu0 }
 0x187   :  { %v556_v50 = vpop.f32.mrf.mxu0 }
 0x189   :  { %v329_v52 = vpop.f32.mrf.mxu0 }
 0x18f   :  { %v559_v56 = vpop.f32.mrf.mxu0 }
 0x191   :  { %v339_v59 = vpop.f32.mrf.mxu0 }
 0x197   :  { %v562_v61 = vpop.f32.mrf.mxu0 }
 0x199   :  { %v349_v63 = vpop.f32.mrf.mxu0 }
 0x19f   :  { %v565_v4 = vpop.f32.mrf.mxu0 }
 0x1a0   :  { %567 = vmatpush3.msra.mxu1 %v565_v4 }
 0x1a1   :  { %v359_v6 = vpop.f32.mrf.mxu0  ;;  %568 = vmatprep.subr.mxu1 %v731_v40 }
 0x1a2   :  { %569 = vmatpush3.msra.mxu1 %v359_v6 }
 0x1a3   :  { %570 = vmatprep.subr.mxu1 %v731_v40 }
 0x1a4   :  { %571 = vmatpush3.msra.mxu1 %v562_v61 }
 0x1a5   :  { %572 = vmatprep.subr.mxu1 %v731_v40 }
 0x1a6   :  { %573 = vmatpush3.msra.mxu1 %v349_v63 }
 0x1a7   :  { %574 = vmatprep.subr.mxu1 %v731_v40 }
 0x1a8   :  { %575 = vmatpush3.msra.mxu1 %v559_v56 }
 0x1a9   :  { %576 = vmatprep.subr.mxu1 %v731_v40 }
 0x1aa   :  { %577 = vmatpush3.msra.mxu1 %v339_v59 }
 0x1ab   :  { %578 = vmatprep.subr.mxu1 %v731_v40 }
 0x1ac   :  { %579 = vmatpush3.msra.mxu1 %v556_v50 }
 0x1ad   :  { %580 = vmatprep.subr.mxu1 %v731_v40 }
 0x1ae   :  { %581 = vmatpush3.msra.mxu1 %v329_v52 }
 0x1af   :  { %582 = vmatprep.subr.mxu1 %v731_v40 }
 0x1b0   :  { %583 = vmatpush3.msra.mxu1 %v553_v47 }
 0x1b1   :  { %584 = vmatprep.subr.mxu1 %v731_v40 }
 0x1b2   :  { %585 = vmatpush3.msra.mxu1 %v800_v48 }
 0x1b3   :  { %586 = vmatprep.subr.mxu1 %v731_v40 }
 0x1b4   :  { %587 = vmatpush3.msra.mxu1 %v796_v45 }
 0x1b5   :  { %588 = vmatprep.subr.mxu1 %v731_v40 }
 0x1b6   :  { %589 = vmatpush3.msra.mxu1 %v798_v46 }
 0x1b7   :  { %590 = vmatprep.subr.mxu1 %v731_v40 }
 0x1b8   :  { %591 = vmatpush3.msra.mxu1 %v792_v43 }
 0x1b9   :  { %592 = vmatprep.subr.mxu1 %v731_v40 }
 0x1ba   :  { %593 = vmatpush3.msra.mxu1 %v794_v44 }
 0x1bb   :  { %594 = vmatprep.subr.mxu1 %v731_v40 }
 0x1bc   :  { %595 = vmatpush3.msra.mxu1 %v788_v41 }
 0x1bd   :  { %596 = vmatprep.subr.mxu1 %v731_v40 }
 0x1be   :  { %597 = vmatpush3.msra.mxu1 %v790_v42 }
 0x1bf   :  { %599 = vmatmul.mubr.f32.vlgmr.msra.gmra.mxu1 %v137_v27 }
 0x27f   :  { %v441_v29 = vpop.f32.mrf.mxu1 }
 0x280   :  { %v442_v30 = vadd.f32 %v496_v28, %v441_v29 }
 0x281   :  { %v600_v31 = vpop.f32.mrf.mxu1 }
 0x282   :  { %445 = vmax.xlane.f32.xlu1 %v442_v30 }
 0x30b   :  { %v446_v32 = vpop.xlane.xlu1 %445 }
 0x30c   :  { %v447_v33 = vsub.f32 %v442_v30, %v446_v32 }
 0x30e   :  { %v448_v34 = vmul.f32 1.442695, %v447_v33 }
 0x310   :  { %628 = vpow2.f32 %v448_v34 }
 0x31d   :  { %v629_v35 = vpop.eup %628 }
 0x31e   :  { %450 = vadd.xlane.f32.xlu1 %v629_v35 }
 0x3a7   :  { %v451_v36 = vpop.xlane.xlu1 %450 }
 0x3a8   :  { %630 = vlog2.f32 %v451_v36 }
 0x3b5   :  { %v631_v37 = vpop.eup %630 }
 0x3b6   :  { %v453_v38 = vmul.f32 0.6931472, %v631_v37 }
 0x3b8   :  { %v454_v39 = vsub.f32 %v447_v33, %v453_v38 }
 0x3ba   :  { %455 = vst [vmem:[#allocation8] sm:$0xff] %v454_v39 }
 0x3bb   :  { %703 = shalt.err (!%p700_p5)
}
 0x3bc   :  { %465 = dma.vmem_to_hbm [thread:$0]  %s463_s6, 128, %s844_s4, [#allocation4]  }
 0x3bd   :  { %716 = dma.done.wait [#allocation4], 128  }
 0x3be   :  { %717 = vsyncadd [#allocation4], 4294967168 }
 0x3bf   :  { %469 = vsyncpa [#allocation3], 1 }
 0x3c0   :  { %470 = vsyncpa [#allocation6], 1 }
 0x3c1   :  { %471 = vsyncpa [#allocation4], 1 }

</bundles_post_ra>
